<compile_context>
chip_gen: v7x
topology: tpu7x:2x2x1
jax: 0.10.0
libtpu: 0.0.40
codegen_flags: <defaults>
</compile_context>

<pallas_src>
import jax
import jax.numpy as jnp
from jax.experimental import pallas as pl
from jax.experimental.pallas import tpu as pltpu


def _attention_kernel(w1t_ref, b1_ref, w2_ref, b2_ref, x_ref, out_ref, att_ref):
    # w1t_ref: (C, C4)      VMEM  conv1 weight, transposed (channels on sublanes)
    # b1_ref:  (C4,)        SMEM
    # w2_ref:  (C4,)        SMEM  conv2 weight (flattened)
    # b2_ref:  (1,)         SMEM
    # x_ref:   (1, C, T)    VMEM  spatial on lanes, channels on sublanes
    # out_ref: (1, C, T)    VMEM
    # att_ref: (1, 1, T)    VMEM  lane-dense attention map
    x = x_ref[0].astype(jnp.float32)              # (C, T)
    w1t = w1t_ref[...].astype(jnp.float32)        # (C, C4)
    C4 = b1_ref.shape[0]
    T = x.shape[-1]

    # a = b2 + sum_o w2[o] * relu(b1[o] + sum_c w1[o, c] * x[c, :])
    a = jnp.zeros((1, T), jnp.float32) + b2_ref[0]
    for o in range(C4):                                        # static, tiny unroll
        prod = x * w1t[:, o:o + 1]                             # VPU, full sublane util
        h = jnp.sum(prod, axis=0, keepdims=True) + b1_ref[o]   # XLU sublane reduce
        h = jnp.maximum(h, 0.0)                                # ReLU
        a = a + w2_ref[o] * h                                  # conv2 contribution
    a = jax.nn.sigmoid(a)                                      # EUP, (1, T)

    out_ref[0] = (x * a).astype(out_ref.dtype)                 # gate, broadcast over C
    att_ref[0] = a.astype(att_ref.dtype)                       # lane-dense store


def attention_module(x_nchw, w1, b1, w2, b2, *, max_tile_hw=16384):
    """Pallas equivalent of AttentionModule.forward.

    x_nchw: (N, C, H, W) float32
    w1:     (C//4, C)    conv1 weight (1x1 kernel squeezed)
    b1:     (C//4,)
    w2:     (1, C//4)    conv2 weight (1x1 kernel squeezed)
    b2:     (1,)
    returns (out_nchw, attention_n1hw)
    """
    N, C, H, W = x_nchw.shape
    C4 = w1.shape[0]
    HW = H * W

    # Keep NCHW: free view to (N, C, HW), spatial on the lane axis.
    x = x_nchw.reshape(N, C, HW)

    # Large lane-aligned spatial tile; pad HW up to a multiple of it if needed.
    tile_hw = min(max_tile_hw, pl.cdiv(HW, 128) * 128)
    hw_pad = pl.cdiv(HW, tile_hw) * tile_hw
    if hw_pad != HW:
        x = jnp.pad(x, ((0, 0), (0, 0), (0, hw_pad - HW)))

    # Weight prep: conv1 weight transposed so channels land on sublanes;
    # the rest become SMEM scalars.
    w1t = jnp.transpose(w1).astype(jnp.float32)   # (C, C4)
    b1f = b1.reshape(C4).astype(jnp.float32)
    w2f = w2.reshape(C4).astype(jnp.float32)
    b2f = b2.reshape(1).astype(jnp.float32)

    grid = (N, hw_pad // tile_hw)

    cost = pl.CostEstimate(
        flops=int(N * hw_pad * (2 * C * C4 + 3 * C4 + C)),
        transcendentals=int(N * hw_pad),
        bytes_accessed=int((2 * N * C * hw_pad + N * hw_pad) * 4),
    )

    out, att = pl.pallas_call(
        _attention_kernel,
        out_shape=(
            jax.ShapeDtypeStruct((N, C, hw_pad), x_nchw.dtype),
            jax.ShapeDtypeStruct((N, 1, hw_pad), jnp.float32),
        ),
        grid_spec=pltpu.PrefetchScalarGridSpec(
            num_scalar_prefetch=0,
            grid=grid,
            in_specs=[
                pl.BlockSpec((C, C4), lambda n, j: (0, 0)),             # w1t (tiny, VMEM-resident)
                pl.BlockSpec(memory_space=pltpu.MemorySpace.SMEM),      # b1
                pl.BlockSpec(memory_space=pltpu.MemorySpace.SMEM),      # w2
                pl.BlockSpec(memory_space=pltpu.MemorySpace.SMEM),      # b2
                pl.BlockSpec((1, C, tile_hw), lambda n, j: (n, 0, j)),  # x tile
            ],
            out_specs=[
                pl.BlockSpec((1, C, tile_hw), lambda n, j: (n, 0, j)),  # gated output
                pl.BlockSpec((1, 1, tile_hw), lambda n, j: (n, 0, j)),  # attention map
            ],
        ),
        compiler_params=pltpu.CompilerParams(
            dimension_semantics=("parallel", "parallel"),
            vmem_limit_bytes=32 * 1024 * 1024,
        ),
        cost_estimate=cost,
    )(w1t, b1f, w2f, b2f, x)

    out_nchw = out[:, :, :HW].reshape(N, C, H, W)
    att_n1hw = att[:, :, :HW].reshape(N, 1, H, W)
    return out_nchw, att_n1hw


def _reference(x_nchw, w1, b1, w2, b2):
    # pure-JAX reference of the PyTorch forward (1x1 convs as einsums)
    h = jnp.einsum("nchw,oc->nohw", x_nchw, w1) + b1[None, :, None, None]
    h = jnp.maximum(h, 0.0)
    a = jnp.einsum("nchw,oc->nohw", h, w2) + b2[None, :, None, None]
    a = jax.nn.sigmoid(a)
    return x_nchw * a, a


if __name__ == "__main__":
    key = jax.random.PRNGKey(0)
    k_x, k_w1, k_b1, k_w2, k_b2 = jax.random.split(key, 5)

    N, C, H, W = 2, 8, 16, 16        # channels must be divisible by 4
    C4 = C // 4

    x = jax.random.normal(k_x, (N, C, H, W), dtype=jnp.float32)
    w1 = jax.random.normal(k_w1, (C4, C), dtype=jnp.float32) * 0.1
    b1 = jax.random.normal(k_b1, (C4,), dtype=jnp.float32) * 0.1
    w2 = jax.random.normal(k_w2, (1, C4), dtype=jnp.float32) * 0.1
    b2 = jax.random.normal(k_b2, (1,), dtype=jnp.float32) * 0.1

    out, att = attention_module(x, w1, b1, w2, b2)
    out = jax.block_until_ready(out)
    att = jax.block_until_ready(att)

    out_ref, att_ref = _reference(x, w1, b1, w2, b2)
    assert out.shape == (N, C, H, W)
    assert att.shape == (N, 1, H, W)
    assert jnp.allclose(out, out_ref, atol=1e-5, rtol=1e-5)
    assert jnp.allclose(att, att_ref, atol=1e-5, rtol=1e-5)

    print("KERNEL_OK")
</pallas_src>

<mosaic_0001>
module attributes {stable_mosaic.version = 11 : i64} {
  func.func @_attention_kernel(%arg0: i32, %arg1: i32, %arg2: memref<8x2xf32, #tpu.memory_space<vmem>>, %arg3: memref<2xf32, #tpu.memory_space<smem>>, %arg4: memref<2xf32, #tpu.memory_space<smem>>, %arg5: memref<1xf32, #tpu.memory_space<smem>>, %arg6: memref<1x8x256xf32, #tpu.memory_space<vmem>>, %arg7: memref<1x8x256xf32, #tpu.memory_space<vmem>>, %arg8: memref<1x1x256xf32, #tpu.memory_space<vmem>>) attributes {dimension_semantics = [#tpu.dimension_semantics<parallel>, #tpu.dimension_semantics<parallel>], iteration_bounds = array<i64: 2, 1>, scalar_prefetch = 0 : i64, scratch_operands = 0 : i64, tpu.core_type = #tpu.core_type<tc>, window_params = [{pipeline_mode = #tpu.pipeline_mode<synchronous>, transform_indices = @transform_0, window_bounds = array<i64: 8, 2>}, {transform_indices = @transform_1, window_bounds = array<i64: 2>}, {transform_indices = @transform_2, window_bounds = array<i64: 2>}, {transform_indices = @transform_3, window_bounds = array<i64: 1>}, {transform_indices = @transform_4, window_bounds = array<i64: 1, 8, 256>}, {transform_indices = @transform_5, window_bounds = array<i64: 1, 8, 256>}, {transform_indices = @transform_6, window_bounds = array<i64: 1, 1, 256>}]} {
    %c0 = arith.constant 0 : index
    %c0_0 = arith.constant 0 : index
    %c0_1 = arith.constant 0 : index
    %0 = vector.load %arg6[%c0, %c0_0, %c0_1] : memref<1x8x256xf32, #tpu.memory_space<vmem>>, vector<1x8x256xf32>
    %1 = vector.shape_cast %0 : vector<1x8x256xf32> to vector<8x256xf32>
    %c0_2 = arith.constant 0 : index
    %c0_3 = arith.constant 0 : index
    %2 = vector.load %arg2[%c0_2, %c0_3] : memref<8x2xf32, #tpu.memory_space<vmem>>, vector<8x2xf32>
    %cst = arith.constant 0.000000e+00 : f32
    %3 = vector.broadcast %cst : f32 to vector<1x256xf32>
    %c0_4 = arith.constant 0 : index
    %4 = memref.load %arg5[%c0_4] : memref<1xf32, #tpu.memory_space<smem>>
    %5 = vector.broadcast %4 : f32 to vector<1x256xf32>
    %6 = arith.addf %3, %5 : vector<1x256xf32>
    %7 = vector.extract_strided_slice %2 {offsets = [0, 0], sizes = [8, 1], strides = [1, 1]} : vector<8x2xf32> to vector<8x1xf32>
    %8 = vector.broadcast %7 : vector<8x1xf32> to vector<8x256xf32>
    %9 = arith.mulf %1, %8 : vector<8x256xf32>
    %cst_5 = arith.constant dense<0.000000e+00> : vector<256xf32>
    %10 = vector.multi_reduction <add>, %9, %cst_5 [0] : vector<8x256xf32> to vector<256xf32>
    %11 = vector.shape_cast %10 : vector<256xf32> to vector<1x256xf32>
    %c0_6 = arith.constant 0 : index
    %12 = memref.load %arg3[%c0_6] : memref<2xf32, #tpu.memory_space<smem>>
    %13 = vector.broadcast %12 : f32 to vector<1x256xf32>
    %14 = arith.addf %11, %13 : vector<1x256xf32>
    %cst_7 = arith.constant 0.000000e+00 : f32
    %15 = vector.broadcast %cst_7 : f32 to vector<1x256xf32>
    %16 = arith.maximumf %14, %15 : vector<1x256xf32>
    %c0_8 = arith.constant 0 : index
    %17 = memref.load %arg4[%c0_8] : memref<2xf32, #tpu.memory_space<smem>>
    %18 = vector.broadcast %17 : f32 to vector<1x256xf32>
    %19 = arith.mulf %18, %16 : vector<1x256xf32>
    %20 = arith.addf %6, %19 : vector<1x256xf32>
    %21 = vector.extract_strided_slice %2 {offsets = [0, 1], sizes = [8, 1], strides = [1, 1]} : vector<8x2xf32> to vector<8x1xf32>
    %22 = vector.broadcast %21 : vector<8x1xf32> to vector<8x256xf32>
    %23 = arith.mulf %1, %22 : vector<8x256xf32>
    %cst_9 = arith.constant dense<0.000000e+00> : vector<256xf32>
    %24 = vector.multi_reduction <add>, %23, %cst_9 [0] : vector<8x256xf32> to vector<256xf32>
    %25 = vector.shape_cast %24 : vector<256xf32> to vector<1x256xf32>
    %c1 = arith.constant 1 : index
    %26 = memref.load %arg3[%c1] : memref<2xf32, #tpu.memory_space<smem>>
    %27 = vector.broadcast %26 : f32 to vector<1x256xf32>
    %28 = arith.addf %25, %27 : vector<1x256xf32>
    %cst_10 = arith.constant 0.000000e+00 : f32
    %29 = vector.broadcast %cst_10 : f32 to vector<1x256xf32>
    %30 = arith.maximumf %28, %29 : vector<1x256xf32>
    %c1_11 = arith.constant 1 : index
    %31 = memref.load %arg4[%c1_11] : memref<2xf32, #tpu.memory_space<smem>>
    %32 = vector.broadcast %31 : f32 to vector<1x256xf32>
    %33 = arith.mulf %32, %30 : vector<1x256xf32>
    %34 = arith.addf %20, %33 : vector<1x256xf32>
    %35 = arith.negf %34 : vector<1x256xf32>
    %36 = math.exp %35 : vector<1x256xf32>
    %cst_12 = arith.constant 1.000000e+00 : f32
    %37 = vector.broadcast %cst_12 : f32 to vector<1x256xf32>
    %38 = arith.addf %37, %36 : vector<1x256xf32>
    %39 = arith.divf %37, %38 : vector<1x256xf32>
    %40 = vector.broadcast %39 : vector<1x256xf32> to vector<8x256xf32>
    %41 = arith.mulf %1, %40 : vector<8x256xf32>
    %c0_13 = arith.constant 0 : index
    %c0_14 = arith.constant 0 : index
    %c0_15 = arith.constant 0 : index
    %42 = vector.load %arg7[%c0_13, %c0_14, %c0_15] : memref<1x8x256xf32, #tpu.memory_space<vmem>>, vector<1x8x256xf32>
    %43 = vector.shape_cast %42 : vector<1x8x256xf32> to vector<8x256xf32>
    %44 = vector.shape_cast %41 : vector<8x256xf32> to vector<1x8x256xf32>
    tpu.vector_store %arg7[%c0_13, %c0_14, %c0_15], %44 {strides = array<i32>} : memref<1x8x256xf32, #tpu.memory_space<vmem>>, vector<1x8x256xf32>,
    %c0_16 = arith.constant 0 : index
    %c0_17 = arith.constant 0 : index
    %c0_18 = arith.constant 0 : index
    %45 = vector.load %arg8[%c0_16, %c0_17, %c0_18] : memref<1x1x256xf32, #tpu.memory_space<vmem>>, vector<1x1x256xf32>
    %46 = vector.shape_cast %45 : vector<1x1x256xf32> to vector<1x256xf32>
    %47 = vector.shape_cast %39 : vector<1x256xf32> to vector<1x1x256xf32>
    tpu.vector_store %arg8[%c0_16, %c0_17, %c0_18], %47 {strides = array<i32>} : memref<1x1x256xf32, #tpu.memory_space<vmem>>, vector<1x1x256xf32>,
    return
  }
  func.func @transform_0(%arg0: i32, %arg1: i32) -> (i32, i32) {
    %c0_i32 = arith.constant 0 : i32
    %c0_i32_0 = arith.constant 0 : i32
    %c0_i32_1 = arith.constant 0 : i32
    return %c0_i32, %c0_i32_0 : i32, i32
  }
  func.func @transform_1(%arg0: i32, %arg1: i32) -> i32 {
    %c0_i32 = arith.constant 0 : i32
    %c0_i32_0 = arith.constant 0 : i32
    return %c0_i32 : i32
  }
  func.func @transform_2(%arg0: i32, %arg1: i32) -> i32 {
    %c0_i32 = arith.constant 0 : i32
    %c0_i32_0 = arith.constant 0 : i32
    return %c0_i32 : i32
  }
  func.func @transform_3(%arg0: i32, %arg1: i32) -> i32 {
    %c0_i32 = arith.constant 0 : i32
    %c0_i32_0 = arith.constant 0 : i32
    return %c0_i32 : i32
  }
  func.func @transform_4(%arg0: i32, %arg1: i32) -> (i32, i32, i32) {
    %c0_i32 = arith.constant 0 : i32
    %c0_i32_0 = arith.constant 0 : i32
    return %arg0, %c0_i32, %arg1 : i32, i32, i32
  }
  func.func @transform_5(%arg0: i32, %arg1: i32) -> (i32, i32, i32) {
    %c0_i32 = arith.constant 0 : i32
    %c0_i32_0 = arith.constant 0 : i32
    return %arg0, %c0_i32, %arg1 : i32, i32, i32
  }
  func.func @transform_6(%arg0: i32, %arg1: i32) -> (i32, i32, i32) {
    %c0_i32 = arith.constant 0 : i32
    %c0_i32_0 = arith.constant 0 : i32
    return %arg0, %c0_i32, %arg1 : i32, i32, i32
  }
}

</mosaic_0001>

<bundles_post_ra>
// kernel: tpu_custom_call.1
= control target key start
LH: loop header
LB: loop body
LE: loop exit
PB: predicated region body
PF: predicated region fallthrough
CT: control target
= control target key end

     0   :  { %s1242_s0 = inlined_call_operand.vmem [shape: f32[8,2], index: 0, kind: input, shape index: {}]   ;;  %s1243_s1 = inlined_call_operand.vmem [shape: f32[2], index: 1, kind: input, shape index: {}]   ;;  %s1244_s2 = inlined_call_operand.vmem [shape: f32[2], index: 2, kind: input, shape index: {}]   ;;  %s1245_s3 = inlined_call_operand.<no memory space> [shape: f32[1], index: 3, kind: input, shape index: {}]   ;;  %s1246_s4 = inlined_call_operand.hbm [shape: f32[2,8,256], index: 4, kind: input, shape index: {}]   ;;  %s1247_s5 = inlined_call_operand.hbm [shape: f32[2,8,256], index: 5, kind: output, shape index: {0}]   ;;  %s1248_s6 = inlined_call_operand.hbm [shape: f32[2,1,256], index: 6, kind: output, shape index: {1}]  }
   0x1   :  { %12 = sst [smem:[#allocation2]] %s1245_s3 }
   0x2   :  { %13 = vsyncpa [#allocation6], 0 }
   0x3   :  { %14 = vsyncpa [#allocation8], 0 }
   0x4   :  { %15 = vsyncpa [#allocation4], 0 }
   0x5   :  { %17 = vsyncpa [#allocation4 + $0x1], 0 }
   0x6   :  { %18 = vsyncpa [#allocation5], 0 }
   0x7   :  { %20 = vsyncpa [#allocation5 + $0x1], 0 }
   0x8   :  { %21 = vsyncpa [#allocation12], 0 }
   0x9   :  { %23 = vsyncpa [#allocation12 + $0x1], 0  ;;  %s976_s23 = smov 0   ;;  %s978_s24 = smov 0  }
   0xa   :  { %s980_s25 = smov 0   ;;  %s982_s26 = smov 0  }
   0xb   :  { %s984_s27 = smov 0   ;;  %s986_s28 = smov 0  }
   0xc LB: > { %s615_s3 = sadd.s32 4294967295, %s928_s28   ;;  %s616_s29 = sadd.s32 4294967294, %s928_s28   ;;  %s928_s28 = sphi %s986_s28, %s29_s28   ;;  %s924_s27 = sphi %s984_s27, %s1271_s27   ;;  %s920_s26 = sphi %s982_s26, %s1270_s26   ;;  %s916_s25 = sphi %s980_s25, %s1269_s25   ;;  %s912_s24 = sphi %s978_s24, %s1268_s24   ;;  %s908_s23 = sphi %s976_s23, %s1267_s23  }
   0xd   : > { %p147_p0 = scmp.ne.s32.totalorder %s912_s24, %s908_s23  ;;  %p1010_p1 = scmp.eq.s32.totalorder %s615_s3, 0 }
   0xe   : > { %p1014_p2 = scmp.eq.s32.totalorder %s615_s3, 1  ;;  %p179_p3 = scmp.eq.s32.totalorder %s616_s29, 1 }
   0xf   : > { %s1253_s30 = scalar_select %p1010_p1, 1, 0 }
  0x10   : > { %s1254_s7 = scalar_select %p1014_p2, 1, 0 }
  0x11   : > { %p1020_p4 = por %p1010_p1, %p147_p0  ;;  %p617_p5 = scmp.ge.s32.totalorder %s928_s28, 1 }
  0x12   : > { %p1025_p6 = por %p179_p3, %p147_p0  ;;  %p214_p7 = scmp.lt.s32.totalorder %s928_s28, 3 }
  0x13   : > { %s1255_s8 = scalar_select %p1020_p4, 1, 0 }
  0x14   : > { %s1256_s9 = scalar_select %p1025_p6, 1, 0 }
  0x15   : > { %s230_s12 = sshll.u32 %s1243_s1, 4  ;;  %p1033_p8 = pnand %p617_p5, %p214_p7  ;;  %s231_s12 = int_to_ptr.vmem [resolvable:$true] %s230_s12 }
  0x16   : > { %s241_s16 = sshll.u32 %s1244_s2, 4  ;;  %s746_s18 = scalar_lea.vmem %s231_s12, 16  ;;  %s242_s16 = int_to_ptr.vmem [resolvable:$true] %s241_s16 }
  0x17   : > { %s1257_s13 = scalar_select %p1033_p8, 1, 0 }
  0x18   : > { %p659_p10 = pneg %p1033_p8  ;;  %p747_p12 = scmp.ne.s32.totalorder %s231_s12, %s746_s18 }
  0x19   : > { %p754_p5 = scmp.lt.s32.totalorder %s231_s12, %s231_s12  ;;  %p755_p7 = scmp.lt.s32.totalorder %s746_s18, %s746_s18 }
  0x1a   : > { %p1045_p11 = pnand %p659_p10, %p1010_p1 }
  0x1b   : > { %p756_p9 = por %p755_p7, %p754_p5 }
  0x1c   : > { %p748_p13 = pneg %p1045_p11 }
  0x1e   : > { %p749_p0 = pnand %p748_p13, %p747_p12 }
  0x20   : > { %p750_p3 = pneg %p749_p0 }
  0x22   : > { %p757_p6 = pnand %p756_p9, %p750_p3 }
  0x24   : > { %760 = shalt.err (!%p757_p6)
}
  0x25   : > { %s930_s19 = smov [#allocation3]   ;;  %s761_s20 = scalar_lea.vmem %s242_s16, 16 }
  0x26   : > { %662 = dma.vmem_to_smem (!%p1045_p11), %s231_s12, 16, %s930_s19, [#allocation6]  }
  0x27   : > { %p762_p10 = scmp.ne.s32.totalorder %s242_s16, %s761_s20  ;;  %p769_p8 = scmp.lt.s32.totalorder %s242_s16, %s242_s16 }
  0x28   : > { %p770_p2 = scmp.lt.s32.totalorder %s761_s20, %s761_s20 }
  0x29   : > { %p764_p4 = pnand %p762_p10, %p748_p13 }
  0x2a   : > { %p771_p12 = por %p770_p2, %p769_p8 }
  0x2b   : > { %p765_p1 = pneg %p764_p4 }
  0x2d   : > { %p772_p0 = pnand %p771_p12, %p765_p1 }
  0x2f   : > { %775 = shalt.err (!%p772_p0)
}
  0x30   : > { %s931_s21 = smov [#allocation7]   ;;  %s41_s22 = sadd.s32 1, %s924_s27 }
  0x31   : > { %665 = dma.vmem_to_smem (!%p1045_p11), %s242_s16, 16, %s931_s21, [#allocation8]  }
  0x32   : > { %s134_s3 = sadd.s32 1, %s916_s25  ;;  %p43_p2 = scmp.ge.s32.totalorder %s41_s22, 2 }
  0x33   : > { %p141_p1 = scmp.ne.s32.totalorder %s916_s25, %s912_s24  ;;  %p142_p4 = scmp.eq.s32.totalorder %s928_s28, 0 }
  0x34   : > { %p679_p6 = scmp.lt.s32.totalorder %s928_s28, 2  ;;  %s1273_s22 = smov (%p43_p2, %s41_s22), 0 }
  0x35   : > { %p143_p8 = por %p142_p4, %p141_p1  ;;  %p1259_p9 = scmp.ne.s32.totalorder %s1254_s7, 0 }
  0x36   : > { %s129_s10 = ssub.s32 %s924_s27, %s1273_s22  ;;  %s255_s11 = sand.u32 1, %s916_s25  }
  0x37   : > { %p1065_p13 = por %p1259_p9, %p141_p1  ;;  %p132_p3 = scmp.eq.s32.totalorder %s129_s10, 0 }
  0x38   : > { %s621_s12 = sshll.u32 %s255_s11, 4  ;;  %s642_s14 = sshll.u32 %s924_s27, 8 }
  0x39   : > { %s1074_s15 = scalar_select %p132_p3, %s916_s25, %s134_s3  }
  0x3a   : > { %s1079_s18 = scalar_lea.hbm %s1246_s4, %s642_s14  ;;  %s259_s7 = scalar_lea.vmem [#allocation9], %s621_s12 }
  0x3b   : > { %s269_s19 = sshll.u32 %s259_s7, 4  ;;  %p1083_p11 = pnand %p679_p6, %p143_p8  ;;  %s1087_s19 = int_to_ptr.vmem [resolvable:$true] %s269_s19 }
  0x3c   : > { %s256_s21 = scalar_lea.sflag [#allocation4], %s255_s11  ;;  %s776_s3 = scalar_lea.hbm %s1079_s18, 256 }
  0x3d   : > { %p777_p5 = scmp.ne.s32.totalorder %s1079_s18, %s776_s3  ;;  %p778_p7 = pneg %p1083_p11 }
  0x3e   : > { %s781_s14 = scalar_lea.hbm %s1246_s4, 512  ;;  %p782_p0 = scmp.lt.u32.totalorder %s1079_s18, %s1246_s4 }
  0x3f   : > { %p779_p10 = pnand %p778_p7, %p777_p5  ;;  %p783_p2 = scmp.lt.u32.totalorder %s781_s14, %s776_s3 }
  0x40   : > { %p785_p4 = scmp.lt.u32.totalorder %s776_s3, %s1079_s18 }
  0x41   : > { %p780_p12 = pneg %p779_p10  ;;  %p784_p1 = por %p783_p2, %p782_p0 }
  0x43   : > { %p786_p6 = por %p785_p4, %p784_p1 }
  0x45   : > { %p787_p8 = pnand %p786_p6, %p780_p12 }
  0x47   : > { %790 = shalt.err (!%p787_p8)
}
  0x48   : > { %s791_s11 = scalar_lea.vmem %s1087_s19, 256  ;;  %s932_s7 = smov [#allocation9]  }
  0x49   : > { %p792_p9 = scmp.ne.s32.totalorder %s1087_s19, %s791_s11  ;;  %s796_s10 = sshll.u32 %s932_s7, 4  ;;  %s797_s10 = int_to_ptr.vmem [resolvable:$false] %s796_s10 }
  0x4a   : > { %s798_s12 = scalar_lea.vmem %s797_s10, 512  ;;  %p799_p10 = scmp.lt.s32.totalorder %s1087_s19, %s797_s10 }
  0x4b   : > { %p794_p3 = pnand %p792_p9, %p778_p7  ;;  %p800_p0 = scmp.lt.s32.totalorder %s798_s12, %s791_s11 }
  0x4d   : > { %p795_p5 = pneg %p794_p3  ;;  %p801_p2 = por %p800_p0, %p799_p10 }
  0x4f   : > { %p802_p1 = pnand %p801_p2, %p795_p5 }
  0x51   : > { %805 = shalt.err (!%p802_p1)
}
  0x52   : > { %669 = dma.hbm_to_vmem [thread:$0]  (!%p1083_p11), %s1079_s18, 256, %s1087_s19, %s256_s21  }
  0x53   : > { %p1262_p12 = scmp.ne.s32.totalorder %s1257_s13, 0 }
  0x54   : > { %p1263_p7 = scmp.ne.s32.totalorder (!%p1262_p12), %s1253_s30, 0 }
  0x55   : > { %278 = sbr.rel (%p1262_p12) target bundleno = 324 (0x144), region = 40 }
  0x5c   : > { %887 = dma.done.wait (%p1263_p7), [#allocation6], 16  }
  0x5d   : > { %889 = vsyncadd (%p1263_p7), [#allocation6], 4294967280 }
  0x5e   : > { %891 = dma.done.wait (%p1263_p7), [#allocation8], 16  }
  0x5f   : > { %893 = vsyncadd (%p1263_p7), [#allocation8], 4294967280  ;;  %s1125_s20 = sand.u32 1, %s912_s24   ;;  %p1264_p11 = scmp.ne.s32.totalorder %s1255_s8, 0 }
  0x60   : > { %s627_s13 = sshll.u32 %s1125_s20, 4  ;;  %s289_s18 = scalar_lea.sflag [#allocation4], %s1125_s20 }
  0x61   : > { %s292_s19 = scalar_lea.vmem [#allocation9], %s627_s13 }
  0x62   : > { %895 = dma.done.wait (%p1264_p11), %s289_s18, 256  }
  0x63   : > { %897 = vsyncadd (%p1264_p11), %s289_s18, 4294967040 }
  0x64   : > { %297 = sfence }
  0x65   : > { %v332_v0 = vld [vmem:[%s1242_s0] sm:$0xff]  ;;  %v933_v1 = vmov 0   ;;  %v934_v2 = vmov 1   ;;  %v1140_v4 = vld [vmem:[%s292_s19 + $0x8] sm:$0xff]  ;;  %s355_s8 = sld [smem:[#allocation3]]  ;;  %s630_s14 = sld [smem:[#allocation3 + $0x1]] }
  0x66   : > { %736 = vset.pattern.permute.xlu0 %v933_v1  ;;  %v1138_v3 = vld [vmem:[%s292_s19] sm:$0xff]  ;;  %s361_s3 = sld [smem:[#allocation7]]  ;;  %s631_s17 = sld [smem:[#allocation7 + $0x1]]  ;;  %v935_v62 = vmov 1966171168  }
  0x67   : > { %338 = vperm.xlu0 %736, %v332_v0   ;;  %s333_s16 = sld [smem:[#allocation2]]  ;;  %v417_v63 = vunpack.c.l.s4 %v935_v62  ;;  %s629_s11 = sshll.u32 %s1125_s20, 1 }
  0x68   : > { %s643_s7 = sshll.u32 %s920_s26, 8  ;;  %s319_s10 = scalar_lea.vmem [#allocation10], %s627_s13 }
  0x69   : > { %v418_v1 = vunpack.c.0.s8 %v417_v63  ;;  %s458_s12 = sshll.u32 %s319_s10, 4  ;;  %s1155_s21 = scalar_lea.hbm %s1247_s5, %s643_s7  ;;  %s1157_s12 = int_to_ptr.vmem [resolvable:$true] %s458_s12 }
  0x6a   : > { %s644_s13 = sshll.u32 %s920_s26, 5  ;;  %s1160_s30 = scalar_lea.vmem [#allocation11], %s629_s11 }
  0x6b   : > { %737 = vset.pattern.permute.xlu0 %v934_v2  ;;  %v356_v25 = vstv %s355_s8  ;;  %v386_v39 = vstv %s630_s14  ;;  %s474_s8 = sshll.u32 %s1160_s30, 4  ;;  %s806_s14 = scalar_lea.vmem %s1157_s12, 256  ;;  %s1194_s8 = int_to_ptr.vmem [resolvable:$true] %s474_s8 }
  0x6c   : > { %368 = vperm.xlu0 %737, %v332_v0   ;;  %v362_v36 = vstv %s361_s3  ;;  %v392_v47 = vstv %s631_s17  ;;  %v419_v0 = vlaneseq  ;;  %s437_s3 = scalar_lea.sflag [#allocation5], %s1125_s20  ;;  %p807_p4 = scmp.ne.s32.totalorder %s1157_s12, %s806_s14 }
  0x6d   : > { %v334_v46 = vstv %s333_s16  ;;  %s936_s16 = smov [#allocation10]  }
  0x6e   : > { %v420_v2 = vshrl.u32 %v419_v0, 7  ;;  %p808_p6 = pnand %p807_p4, %p1065_p13  ;;  %s810_s17 = sshll.u32 %s936_s16, 4  ;;  %s811_s17 = int_to_ptr.vmem [resolvable:$false] %s810_s17 }
  0x6f   : > { %s812_s7 = scalar_lea.vmem %s811_s17, 512  ;;  %p813_p9 = scmp.lt.s32.totalorder %s1157_s12, %s811_s17 }
  0x70   : > { %p809_p8 = pneg %p808_p6  ;;  %p814_p3 = scmp.lt.s32.totalorder %s812_s7, %s806_s14 }
  0x72   : > { %p815_p5 = por %p814_p3, %p813_p9 }
  0x74   : > { %p816_p10 = pnand %p815_p5, %p809_p8 }
  0xe6   : > { %v339_v5 = vpop.permute.xlu0 %338 }
  0xe7   : > { %v341_v6 = vmul.f32 %v339_v5, %v1138_v3  ;;  %v342_v7 = vmul.f32 %v339_v5, %v1140_v4 }
  0xe9   : > { %v343_v8 = vrot.slane %v341_v6, 4  ;;  %v349_v9 = vrot.slane %v342_v7, 4 }
  0xeb   : > { %v344_v10 = vadd.f32 %v343_v8, %v341_v6  ;;  %v350_v11 = vadd.f32 %v349_v9, %v342_v7  ;;  %v369_v12 = vpop.permute.xlu0 %368  ;;  %v421_v6 = vsub.s32 %v418_v1, %v420_v2 }
  0xec   : > { %v371_v13 = vmul.f32 %v369_v12, %v1138_v3  ;;  %v372_v14 = vmul.f32 %v369_v12, %v1140_v4 }
  0xed   : > { %v345_v15 = vrot.slane %v344_v10, 2  ;;  %v351_v16 = vrot.slane %v350_v11, 2 }
  0xee   : > { %v373_v17 = vrot.slane %v371_v13, 4  ;;  %v379_v18 = vrot.slane %v372_v14, 4 }
  0xef   : > { %v346_v19 = vadd.f32 %v345_v15, %v344_v10  ;;  %v352_v20 = vadd.f32 %v351_v16, %v350_v11 }
  0xf0   : > { %v374_v21 = vadd.f32 %v373_v17, %v371_v13  ;;  %v380_v22 = vadd.f32 %v379_v18, %v372_v14 }
  0xf1   : > { %v347_v23 = vrot.slane %v346_v19, 1  ;;  %v353_v24 = vrot.slane %v352_v20, 1 }
  0xf2   : > { %v375_v26 = vrot.slane %v374_v21, 2  ;;  %v381_v27 = vrot.slane %v380_v22, 2 }
  0xf3   : > { %v348_v28 = vadd.f32 %v347_v23, %v346_v19  ;;  %v354_v29 = vadd.f32 %v353_v24, %v352_v20 }
  0xf4   : > { %v376_v30 = vadd.f32 %v375_v26, %v374_v21  ;;  %v382_v31 = vadd.f32 %v381_v27, %v380_v22 }
  0xf5   : > { %v357_v32 = vadd.f32 %v356_v25, %v348_v28  ;;  %v358_v33 = vadd.f32 %v356_v25, %v354_v29 }
  0xf6   : > { %v377_v34 = vrot.slane %v376_v30, 1  ;;  %v383_v35 = vrot.slane %v382_v31, 1 }
  0xf7   : > { %v359_v37 = vmax.f32 %v357_v32, 0.0  ;;  %v360_v38 = vmax.f32 %v358_v33, 0.0 }
  0xf8   : > { %v378_v40 = vadd.f32 %v377_v34, %v376_v30  ;;  %v384_v41 = vadd.f32 %v383_v35, %v382_v31 }
  0xf9   : > { %v363_v42 = vmul.f32 %v362_v36, %v359_v37  ;;  %v364_v43 = vmul.f32 %v362_v36, %v360_v38 }
  0xfa   : > { %v387_v44 = vadd.f32 %v386_v39, %v378_v40  ;;  %v388_v45 = vadd.f32 %v386_v39, %v384_v41 }
  0xfb   : > { %v365_v50 = vadd.f32 %v363_v42, %v334_v46  ;;  %v366_v51 = vadd.f32 %v364_v43, %v334_v46 }
  0xfc   : > { %v389_v48 = vmax.f32 %v387_v44, 0.0  ;;  %v390_v49 = vmax.f32 %v388_v45, 0.0 }
  0xfe   : > { %v393_v52 = vmul.f32 %v392_v47, %v389_v48  ;;  %v394_v53 = vmul.f32 %v392_v47, %v390_v49 }
 0x100   : > { %v395_v54 = vadd.f32 %v393_v52, %v365_v50  ;;  %v396_v55 = vadd.f32 %v394_v53, %v366_v51 }
 0x102   : > { %v632_v56 = vmul.f32 -1.442695, %v395_v54  ;;  %v633_v57 = vmul.f32 -1.442695, %v396_v55 }
 0x104   : > { %738 = vpow2.f32 %v632_v56 }
 0x105   : > { %740 = vpow2.f32 %v633_v57 }
 0x10e   : > { %v739_v58 = vpop.eup %738 }
 0x10f   : > { %v741_v59 = vpop.eup %740  ;;  %v403_v60 = vadd.f32 1.0, %v739_v58 }
 0x110   : > { %v404_v61 = vadd.f32 1.0, %v741_v59 }
 0x111   : > { %742 = vrcp.f32 %v403_v60 }
 0x112   : > { %744 = vrcp.f32 %v404_v61 }
 0x11b   : > { %v743_v5 = vpop.eup %742 }
 0x11c   : > { %v745_v7 = vpop.eup %744  ;;  %v409_v8 = vmul.f32 %v743_v5, %v1138_v3 }
 0x11d   : > { %v410_v9 = vmul.f32 %v745_v7, %v1140_v4  ;;  %v415_v10 = vcombine.low %v743_v5, %v745_v7 }
 0x11e   : > { %411 = vst [vmem:[%s319_s10] sm:$0xff] %v409_v8 }
 0x11f   : > { %412 = vst [vmem:[%s319_s10 + $0x8] sm:$0xff] %v410_v9  ;;  %v422_v3 = vrot.slane %v415_v10, %v421_v6 }
 0x120   : > { %819 = shalt.err (!%p816_p10)
}
 0x121   : > { %s820_s11 = scalar_lea.hbm %s1155_s21, 256  ;;  %s824_s19 = scalar_lea.hbm %s1247_s5, 512 }
 0x122   : > { %p821_p0 = scmp.ne.s32.totalorder %s1155_s21, %s820_s11  ;;  %p825_p12 = scmp.lt.u32.totalorder %s1155_s21, %s1247_s5 }
 0x123   : > { %p826_p7 = scmp.lt.u32.totalorder %s824_s19, %s820_s11  ;;  %p828_p4 = scmp.lt.u32.totalorder %s820_s11, %s1155_s21 }
 0x124   : > { %p822_p2 = pnand %p821_p0, %p1065_p13 }
 0x125   : > { %p827_p11 = por %p826_p7, %p825_p12 }
 0x126   : > { %p823_p1 = pneg %p822_p2 }
 0x127   : > { %p829_p6 = por %p828_p4, %p827_p11 }
 0x129   : > { %p830_p8 = pnand %p829_p6, %p823_p1 }
 0x12b   : > { %833 = shalt.err (!%p830_p8)
}
 0x12c   : > { %655 = dma.vmem_to_hbm [thread:$0]  (%p1065_p13), %s1157_s12, 256, %s1155_s21, %s437_s3   ;;  %vm433_vm0 = vcmp.lt.s32.totalorder %v419_v0, 256  ;;  %v429_v4 = vrot.slane %v422_v3, %v421_v6 }
 0x12d   : > { %s1190_s11 = scalar_lea.hbm %s1248_s6, %s644_s13  ;;  %s442_s10 = scalar_lea.sflag [#allocation12], %s1125_s20 }
 0x12e   : > { %435 = vst.msk [vmem:[%s1160_s30] sm:$0x3] %vm433_vm0, %v429_v4  ;;  %s834_s18 = scalar_lea.vmem %s1194_s8, 32  ;;  %s937_s12 = smov [#allocation11]  }
 0x12f   : > { %p835_p9 = scmp.ne.s32.totalorder %s1194_s8, %s834_s18  ;;  %s838_s26 = sshll.u32 %s937_s12, 4  ;;  %s839_s26 = int_to_ptr.vmem [resolvable:$false] %s838_s26 }
 0x130   : > { %s840_s21 = scalar_lea.vmem %s839_s26, 64  ;;  %p841_p10 = scmp.lt.s32.totalorder %s1194_s8, %s839_s26 }
 0x131   : > { %p836_p3 = pnand %p835_p9, %p1065_p13  ;;  %p842_p0 = scmp.lt.s32.totalorder %s840_s21, %s834_s18 }
 0x133   : > { %p837_p5 = pneg %p836_p3  ;;  %p843_p2 = por %p842_p0, %p841_p10 }
 0x135   : > { %p844_p1 = pnand %p843_p2, %p837_p5 }
 0x137   : > { %847 = shalt.err (!%p844_p1)
}
 0x138   : > { %s848_s20 = scalar_lea.hbm %s1190_s11, 32  ;;  %s852_s3 = scalar_lea.hbm %s1248_s6, 64 }
 0x139   : > { %p849_p12 = scmp.ne.s32.totalorder %s1190_s11, %s848_s20  ;;  %p853_p4 = scmp.lt.u32.totalorder %s1190_s11, %s1248_s6 }
 0x13a   : > { %p854_p6 = scmp.lt.u32.totalorder %s852_s3, %s848_s20  ;;  %p856_p9 = scmp.lt.u32.totalorder %s848_s20, %s1190_s11 }
 0x13b   : > { %p850_p7 = pnand %p849_p12, %p1065_p13 }
 0x13c   : > { %p855_p8 = por %p854_p6, %p853_p4 }
 0x13d   : > { %p851_p11 = pneg %p850_p7 }
 0x13e   : > { %p857_p3 = por %p856_p9, %p855_p8 }
 0x140   : > { %p858_p5 = pnand %p857_p3, %p851_p11 }
 0x142   : > { %861 = shalt.err (!%p858_p5)
}
 0x143   : > { %656 = dma.vmem_to_hbm [thread:$0]  (%p1065_p13), %s1194_s8, 32, %s1190_s11, %s442_s10  }
 0x144 PF: > { %s486_s17 = sand.u32 1, %s908_s23   ;;  %p1265_p10 = scmp.ne.s32.totalorder %s1256_s9, 0 }
 0x145   : > { %p1266_p0 = scmp.ge.s32.totalorder %s928_s28, 2  ;;  %s487_s14 = scalar_lea.sflag [#allocation5], %s486_s17 }
 0x147   : > { %p671_p2 = pnand %p1266_p0, %p1265_p10 }
 0x149   : > { %899 = dma.done.wait (!%p671_p2), %s487_s14, 256  }
 0x14a   : > { %901 = vsyncadd (!%p671_p2), %s487_s14, 4294967040  ;;  %s496_s7 = scalar_lea.sflag [#allocation12], %s486_s17 }
 0x14b   : > { %903 = dma.done.wait (!%p671_p2), %s496_s7, 32  }
 0x14c   : > { %905 = vsyncadd (!%p671_p2), %s496_s7, 4294967264  ;;  %s29_s28 = sadd.s32 1, %s928_s28   ;;  %s1267_s23 = smov %s912_s24 }
 0x14d   : > { %p26_p1 = scmp.ge.s32.totalorder %s29_s28, 4   ;;  %s1268_s24 = smov %s916_s25 }
 0x14e   : > { %s1269_s25 = smov %s1074_s15  ;;  %s1270_s26 = smov %s924_s27 }
 0x14f   : > { %s1271_s27 = smov %s1273_s22  ;;  %28 = sbr.rel (!%p26_p1) target bundleno = 12 (0xc), region = 111 }
 0x156   :  { %501 = vsyncpa [#allocation4], 1 }
 0x157   :  { %503 = vsyncpa [#allocation4 + $0x1], 1 }
 0x158   :  { %504 = vsyncpa [#allocation5], 1 }
 0x159   :  { %506 = vsyncpa [#allocation5 + $0x1], 1 }
 0x15a   :  { %507 = vsyncpa [#allocation12], 1 }
 0x15b   :  { %509 = vsyncpa [#allocation12 + $0x1], 1 }
 0x15c   :  { %510 = vsyncpa [#allocation6], 1 }
 0x15d   :  { %512 = vsyncpa [#allocation6 + $0x1], 1 }
 0x15e   :  { %513 = vsyncpa [#allocation8], 1 }

</bundles_post_ra>
